<compile_context>
chip_gen: v6e
topology: v6e:2x2x1
jax: 0.10.0
libtpu: 0.0.40
codegen_flags: <defaults>
</compile_context>

<pallas_src>
import functools
import jax
import jax.numpy as jnp
from jax.experimental import pallas as pl
from jax.experimental.pallas import tpu as pltpu

LANE = 128
NUM_HIDDEN = 4


def _round_up(n, m):
    return ((n + m - 1) // m) * m


def _cdiv(a, b):
    return -(-a // b)


def _tpu_core_count():
    """Best-effort TensorCore count per chip (v7x=2, v5e/v6e=1). Falls back to 1."""
    try:
        info = pltpu.get_tpu_info()
        for name in ("num_cores", "tensor_cores", "cores_per_chip", "num_tensorcores"):
            v = getattr(info, name, None)
            if isinstance(v, int) and v > 0:
                return v
    except Exception:
        pass
    return 1


def _make_kernel(hp):
    """Fused MLP kernel for one batch tile.

    x_ref:     (bb, hp)        bf16   (input features zero-padded to hp lanes)
    wh_ref:    (hp, 4*hp)      bf16   [w1p | w2p | w3p | w4p]
    bh_ref:    (1, 4*hp)       f32    [b1p | b2p | b3p | b4p]
    w56_ref:   (2*hp, cp)      bf16   rows [w5p ; w6p] (zero rows in the padding)
    b56_ref:   (1, cp)         f32    b5 + b6 (zero padded)
    o_ref:     (bb, cp)        bf16   lane-dense output block
    """

    def kernel(x_ref, wh_ref, bh_ref, w56_ref, b56_ref, o_ref):
        x = x_ref[...]                                     # bf16 (bb, hp)
        h = x
        for i in range(NUM_HIDDEN):                        # static unrolled loop
            w = wh_ref[:, i * hp:(i + 1) * hp]             # static 128-aligned slice
            b = bh_ref[:, i * hp:(i + 1) * hp]
            acc = jnp.dot(h, w, preferred_element_type=jnp.float32)
            # bias + ReLU in f32 (v5e-friendly), single cast so next dot is native bf16.
            h = jnp.maximum(acc + b, 0.0).astype(jnp.bfloat16)

        # fc5(h) + fc6(x): two clean K=hp MXU passes against the stacked head weight.
        out = jnp.dot(h, w56_ref[0:hp, :], preferred_element_type=jnp.float32)
        out = out + jnp.dot(x, w56_ref[hp:2 * hp, :], preferred_element_type=jnp.float32)
        out = out + b56_ref[...]
        o_ref[...] = out.astype(o_ref.dtype)               # single bf16 cast at the store

    return kernel


def prepare_params(params):
    """One-time packing of the six nn.Linear layers into 4 lane-dense operands."""
    (w1, b1), (w2, b2), (w3, b3), (w4, b4), (w5, b5), (w6, b6) = params
    d_in = w1.shape[0]
    h4 = w4.shape[1]
    c = w5.shape[1]
    assert w6.shape == (d_in, c)

    hp = _round_up(max(d_in, w1.shape[1], w2.shape[1], w3.shape[1], h4), LANE)
    cp = _round_up(c, LANE)

    def pad2(a, rows, cols):
        return jnp.pad(a, ((0, rows - a.shape[0]), (0, cols - a.shape[1])))

    # Hidden layers: every weight padded to (hp, hp); zero rows/cols keep padded lanes
    # exactly zero through bias (also zero-padded) and ReLU.
    wh = jnp.concatenate([pad2(w, hp, hp) for w in (w1, w2, w3, w4)],
                         axis=1).astype(jnp.bfloat16)                   # (hp, 4*hp)
    bh = jnp.concatenate([pad2(b.astype(jnp.float32), 1, hp)
                          for b in (b1, b2, b3, b4)], axis=1)           # (1, 4*hp)

    # Head: stacked [w5p ; w6p], bias b5 + b6 (applied exactly once).
    w_head = jnp.zeros((2 * hp, cp), jnp.float32)
    w_head = w_head.at[:h4, :c].set(w5).at[hp:hp + d_in, :c].set(w6)
    w_head = w_head.astype(jnp.bfloat16)                                # (2*hp, cp)
    b_head = jnp.zeros((1, cp), jnp.float32).at[:, :c].set(b5 + b6)     # (1, cp)

    meta = dict(d_in=d_in, n_classes=c, hp=hp, cp=cp)
    return (wh, bh, w_head, b_head), meta


def mlp_forward(x, packed, meta, *, num_tiles=None, max_rows_per_tile=1024):
    wh, bh, w_head, b_head = packed
    d_in, c, hp, cp = meta["d_in"], meta["n_classes"], meta["hp"], meta["cp"]
    B = x.shape[0]
    assert x.shape[1] == d_in

    if num_tiles is None:
        num_tiles = _tpu_core_count()

    # Balanced batch tiling: `tiles` equal tiles (multiple-of-16 rows each), one per
    # TensorCore when possible; fall back to more tiles only if a tile would exceed
    # max_rows_per_tile (VMEM is never the binding constraint here).
    b16 = _round_up(max(B, 16), 16)
    tiles = max(1, min(num_tiles, b16 // 16))
    bb = _round_up(_cdiv(b16, tiles), 16)
    while bb > max_rows_per_tile:
        tiles *= 2
        bb = _round_up(_cdiv(b16, tiles), 16)
    bp = bb * tiles

    xb = x.astype(jnp.bfloat16)
    if bp != B or hp != d_in:
        xb = jnp.pad(xb, ((0, bp - B), (0, hp - d_in)))     # single pad op per call

    rep = lambda a: pl.BlockSpec(a.shape, lambda i: (0, 0))  # resident, DMA'd once

    out = pl.pallas_call(
        _make_kernel(hp),
        out_shape=jax.ShapeDtypeStruct((bp, cp), jnp.bfloat16),
        grid=(tiles,),
        in_specs=[pl.BlockSpec((bb, hp), lambda i: (i, 0)),
                  rep(wh), rep(bh), rep(w_head), rep(b_head)],
        out_specs=pl.BlockSpec((bb, cp), lambda i: (i, 0)),
        compiler_params=pltpu.CompilerParams(
            # Batch tiles are independent -> shard across TensorCores on v7x.
            dimension_semantics=("parallel",),
        ),
    )(xb, wh, bh, w_head, b_head)

    return out[:B, :c]


def init_linear(key, in_features, out_features):
    # Mirrors torch.nn.Linear default init: U(-1/sqrt(in), 1/sqrt(in)).
    kw, kb = jax.random.split(key)
    bound = 1.0 / jnp.sqrt(jnp.float32(in_features))
    w = jax.random.uniform(kw, (in_features, out_features), jnp.float32,
                           minval=-bound, maxval=bound)
    b = jax.random.uniform(kb, (1, out_features), jnp.float32,
                           minval=-bound, maxval=bound)
    return w, b


def reference_forward(x, params):
    """Pure-JAX mirror of the kernel numerics (bf16 operands, f32 accumulation)."""
    (w1, b1), (w2, b2), (w3, b3), (w4, b4), (w5, b5), (w6, b6) = params
    bf = lambda a: a.astype(jnp.bfloat16)

    def layer(h, w, b):
        acc = jnp.dot(bf(h), bf(w), preferred_element_type=jnp.float32)
        return jnp.maximum(acc + b, 0.0)

    h = layer(x, w1, b1)
    h = layer(h, w2, b2)
    h = layer(h, w3, b3)
    h = layer(h, w4, b4)
    out5 = jnp.dot(bf(h), bf(w5), preferred_element_type=jnp.float32) + b5
    out6 = jnp.dot(bf(x), bf(w6), preferred_element_type=jnp.float32) + b6
    return out5 + out6


if __name__ == "__main__":
    # Small shapes consistent with the module.
    batch = 64
    input_size, h1, h2, h3, h4, num_classes = 32, 64, 64, 64, 64, 16

    root = jax.random.PRNGKey(0)
    kx, k1, k2, k3, k4, k5, k6 = jax.random.split(root, 7)

    x = jax.random.normal(kx, (batch, input_size), jnp.float32)
    params = (
        init_linear(k1, input_size, h1),
        init_linear(k2, h1, h2),
        init_linear(k3, h2, h3),
        init_linear(k4, h3, h4),
        init_linear(k5, h4, num_classes),
        init_linear(k6, input_size, num_classes),
    )

    # One-time parameter packing, hoisted out of the call path; the whole per-call
    # wrapper (cast/pad -> pallas_call -> slice) is jitted as a single program.
    packed, meta = prepare_params(params)
    packed = jax.tree_util.tree_map(jax.device_put, packed)
    fwd = jax.jit(functools.partial(mlp_forward, packed=packed, meta=meta))

    out = jax.block_until_ready(fwd(x))
    ref = reference_forward(x, params)
    assert out.shape == (batch, num_classes)
    assert out.dtype == jnp.bfloat16
    assert jnp.allclose(out.astype(jnp.float32), ref, atol=1e-2, rtol=1e-2), \
        "mismatch vs reference"

    # Ragged batch (not a multiple of 16 / the tile) goes through the padding path.
    x_ragged = x[:45]
    out_r = jax.block_until_ready(fwd(x_ragged))
    ref_r = reference_forward(x_ragged, params)
    assert out_r.shape == (45, num_classes)
    assert jnp.allclose(out_r.astype(jnp.float32), ref_r, atol=1e-2, rtol=1e-2), \
        "ragged mismatch"

    print("KERNEL_OK")
</pallas_src>

<mosaic_0001>
module attributes {stable_mosaic.version = 11 : i64} {
  func.func @kernel(%arg0: i32, %arg1: memref<64x128xbf16, #tpu.memory_space<vmem>>, %arg2: memref<128x512xbf16, #tpu.memory_space<vmem>>, %arg3: memref<1x512xf32, #tpu.memory_space<vmem>>, %arg4: memref<256x128xbf16, #tpu.memory_space<vmem>>, %arg5: memref<1x128xf32, #tpu.memory_space<vmem>>, %arg6: memref<64x128xbf16, #tpu.memory_space<vmem>>) attributes {dimension_semantics = [#tpu.dimension_semantics<parallel>], iteration_bounds = array<i64: 1>, scalar_prefetch = 0 : i64, scratch_operands = 0 : i64, tpu.core_type = #tpu.core_type<tc>, window_params = [{transform_indices = @transform_0, window_bounds = array<i64: 64, 128>}, {pipeline_mode = #tpu.pipeline_mode<synchronous>, transform_indices = @transform_1, window_bounds = array<i64: 128, 512>}, {pipeline_mode = #tpu.pipeline_mode<synchronous>, transform_indices = @transform_2, window_bounds = array<i64: 1, 512>}, {pipeline_mode = #tpu.pipeline_mode<synchronous>, transform_indices = @transform_3, window_bounds = array<i64: 256, 128>}, {pipeline_mode = #tpu.pipeline_mode<synchronous>, transform_indices = @transform_4, window_bounds = array<i64: 1, 128>}, {transform_indices = @transform_5, window_bounds = array<i64: 64, 128>}]} {
    %c0 = arith.constant 0 : index
    %c0_0 = arith.constant 0 : index
    %0 = vector.load %arg1[%c0, %c0_0] : memref<64x128xbf16, #tpu.memory_space<vmem>>, vector<64x128xbf16>
    %c0_1 = arith.constant 0 : index
    %c0_2 = arith.constant 0 : index
    %1 = vector.load %arg2[%c0_1, %c0_2] : memref<128x512xbf16, #tpu.memory_space<vmem>>, vector<128x128xbf16>
    %c0_3 = arith.constant 0 : index
    %c0_4 = arith.constant 0 : index
    %2 = vector.load %arg3[%c0_3, %c0_4] : memref<1x512xf32, #tpu.memory_space<vmem>>, vector<1x128xf32>
    %cst = arith.constant dense<0.000000e+00> : vector<64x128xf32>
    %3 = tpu.matmul %0, %1, %cst {dimension_numbers = #tpu.dot_dimension_numbers<[1], [0], [0], [1], [0, 0, 1, 1], [], []>} : vector<64x128xbf16>, vector<128x128xbf16>, vector<64x128xf32> -> vector<64x128xf32>
    %4 = vector.broadcast %2 : vector<1x128xf32> to vector<64x128xf32>
    %5 = arith.addf %3, %4 : vector<64x128xf32>
    %cst_5 = arith.constant 0.000000e+00 : f32
    %6 = vector.broadcast %cst_5 : f32 to vector<64x128xf32>
    %7 = arith.maximumf %5, %6 : vector<64x128xf32>
    %8 = arith.truncf %7 : vector<64x128xf32> to vector<64x128xbf16>
    %c0_6 = arith.constant 0 : index
    %c128 = arith.constant 128 : index
    %9 = vector.load %arg2[%c0_6, %c128] : memref<128x512xbf16, #tpu.memory_space<vmem>>, vector<128x128xbf16>
    %c0_7 = arith.constant 0 : index
    %c128_8 = arith.constant 128 : index
    %10 = vector.load %arg3[%c0_7, %c128_8] : memref<1x512xf32, #tpu.memory_space<vmem>>, vector<1x128xf32>
    %cst_9 = arith.constant dense<0.000000e+00> : vector<64x128xf32>
    %11 = tpu.matmul %8, %9, %cst_9 {dimension_numbers = #tpu.dot_dimension_numbers<[1], [0], [0], [1], [0, 0, 1, 1], [], []>} : vector<64x128xbf16>, vector<128x128xbf16>, vector<64x128xf32> -> vector<64x128xf32>
    %12 = vector.broadcast %10 : vector<1x128xf32> to vector<64x128xf32>
    %13 = arith.addf %11, %12 : vector<64x128xf32>
    %cst_10 = arith.constant 0.000000e+00 : f32
    %14 = vector.broadcast %cst_10 : f32 to vector<64x128xf32>
    %15 = arith.maximumf %13, %14 : vector<64x128xf32>
    %16 = arith.truncf %15 : vector<64x128xf32> to vector<64x128xbf16>
    %c0_11 = arith.constant 0 : index
    %c256 = arith.constant 256 : index
    %17 = vector.load %arg2[%c0_11, %c256] : memref<128x512xbf16, #tpu.memory_space<vmem>>, vector<128x128xbf16>
    %c0_12 = arith.constant 0 : index
    %c256_13 = arith.constant 256 : index
    %18 = vector.load %arg3[%c0_12, %c256_13] : memref<1x512xf32, #tpu.memory_space<vmem>>, vector<1x128xf32>
    %cst_14 = arith.constant dense<0.000000e+00> : vector<64x128xf32>
    %19 = tpu.matmul %16, %17, %cst_14 {dimension_numbers = #tpu.dot_dimension_numbers<[1], [0], [0], [1], [0, 0, 1, 1], [], []>} : vector<64x128xbf16>, vector<128x128xbf16>, vector<64x128xf32> -> vector<64x128xf32>
    %20 = vector.broadcast %18 : vector<1x128xf32> to vector<64x128xf32>
    %21 = arith.addf %19, %20 : vector<64x128xf32>
    %cst_15 = arith.constant 0.000000e+00 : f32
    %22 = vector.broadcast %cst_15 : f32 to vector<64x128xf32>
    %23 = arith.maximumf %21, %22 : vector<64x128xf32>
    %24 = arith.truncf %23 : vector<64x128xf32> to vector<64x128xbf16>
    %c0_16 = arith.constant 0 : index
    %c384 = arith.constant 384 : index
    %25 = vector.load %arg2[%c0_16, %c384] : memref<128x512xbf16, #tpu.memory_space<vmem>>, vector<128x128xbf16>
    %c0_17 = arith.constant 0 : index
    %c384_18 = arith.constant 384 : index
    %26 = vector.load %arg3[%c0_17, %c384_18] : memref<1x512xf32, #tpu.memory_space<vmem>>, vector<1x128xf32>
    %cst_19 = arith.constant dense<0.000000e+00> : vector<64x128xf32>
    %27 = tpu.matmul %24, %25, %cst_19 {dimension_numbers = #tpu.dot_dimension_numbers<[1], [0], [0], [1], [0, 0, 1, 1], [], []>} : vector<64x128xbf16>, vector<128x128xbf16>, vector<64x128xf32> -> vector<64x128xf32>
    %28 = vector.broadcast %26 : vector<1x128xf32> to vector<64x128xf32>
    %29 = arith.addf %27, %28 : vector<64x128xf32>
    %cst_20 = arith.constant 0.000000e+00 : f32
    %30 = vector.broadcast %cst_20 : f32 to vector<64x128xf32>
    %31 = arith.maximumf %29, %30 : vector<64x128xf32>
    %32 = arith.truncf %31 : vector<64x128xf32> to vector<64x128xbf16>
    %c0_21 = arith.constant 0 : index
    %c0_22 = arith.constant 0 : index
    %33 = vector.load %arg4[%c0_21, %c0_22] : memref<256x128xbf16, #tpu.memory_space<vmem>>, vector<128x128xbf16>
    %cst_23 = arith.constant dense<0.000000e+00> : vector<64x128xf32>
    %34 = tpu.matmul %32, %33, %cst_23 {dimension_numbers = #tpu.dot_dimension_numbers<[1], [0], [0], [1], [0, 0, 1, 1], [], []>} : vector<64x128xbf16>, vector<128x128xbf16>, vector<64x128xf32> -> vector<64x128xf32>
    %c128_24 = arith.constant 128 : index
    %c0_25 = arith.constant 0 : index
    %35 = vector.load %arg4[%c128_24, %c0_25] : memref<256x128xbf16, #tpu.memory_space<vmem>>, vector<128x128xbf16>
    %cst_26 = arith.constant dense<0.000000e+00> : vector<64x128xf32>
    %36 = tpu.matmul %0, %35, %cst_26 {dimension_numbers = #tpu.dot_dimension_numbers<[1], [0], [0], [1], [0, 0, 1, 1], [], []>} : vector<64x128xbf16>, vector<128x128xbf16>, vector<64x128xf32> -> vector<64x128xf32>
    %37 = arith.addf %34, %36 : vector<64x128xf32>
    %c0_27 = arith.constant 0 : index
    %c0_28 = arith.constant 0 : index
    %38 = vector.load %arg5[%c0_27, %c0_28] : memref<1x128xf32, #tpu.memory_space<vmem>>, vector<1x128xf32>
    %39 = vector.broadcast %38 : vector<1x128xf32> to vector<64x128xf32>
    %40 = arith.addf %37, %39 : vector<64x128xf32>
    %41 = arith.truncf %40 : vector<64x128xf32> to vector<64x128xbf16>
    %c0_29 = arith.constant 0 : index
    %c0_30 = arith.constant 0 : index
    %42 = vector.load %arg6[%c0_29, %c0_30] : memref<64x128xbf16, #tpu.memory_space<vmem>>, vector<64x128xbf16>
    tpu.vector_store %arg6[%c0_29, %c0_30], %41 {strides = array<i32>} : memref<64x128xbf16, #tpu.memory_space<vmem>>, vector<64x128xbf16>,
    return
  }
  func.func @transform_0(%arg0: i32) -> (i32, i32) {
    %c0_i32 = arith.constant 0 : i32
    %c0_i32_0 = arith.constant 0 : i32
    return %arg0, %c0_i32 : i32, i32
  }
  func.func @transform_1(%arg0: i32) -> (i32, i32) {
    %c0_i32 = arith.constant 0 : i32
    %c0_i32_0 = arith.constant 0 : i32
    %c0_i32_1 = arith.constant 0 : i32
    return %c0_i32, %c0_i32_0 : i32, i32
  }
  func.func @transform_2(%arg0: i32) -> (i32, i32) {
    %c0_i32 = arith.constant 0 : i32
    %c0_i32_0 = arith.constant 0 : i32
    %c0_i32_1 = arith.constant 0 : i32
    return %c0_i32, %c0_i32_0 : i32, i32
  }
  func.func @transform_3(%arg0: i32) -> (i32, i32) {
    %c0_i32 = arith.constant 0 : i32
    %c0_i32_0 = arith.constant 0 : i32
    %c0_i32_1 = arith.constant 0 : i32
    return %c0_i32, %c0_i32_0 : i32, i32
  }
  func.func @transform_4(%arg0: i32) -> (i32, i32) {
    %c0_i32 = arith.constant 0 : i32
    %c0_i32_0 = arith.constant 0 : i32
    %c0_i32_1 = arith.constant 0 : i32
    return %c0_i32, %c0_i32_0 : i32, i32
  }
  func.func @transform_5(%arg0: i32) -> (i32, i32) {
    %c0_i32 = arith.constant 0 : i32
    %c0_i32_0 = arith.constant 0 : i32
    return %arg0, %c0_i32 : i32, i32
  }
}

</mosaic_0001>

<bundles_post_ra>
// kernel: mlp_forward.1
= control target key start
LH: loop header
LB: loop body
LE: loop exit
PB: predicated region body
PF: predicated region fallthrough
CT: control target
= control target key end

     0   :  { %10 = vsyncpa [#allocation3], 0  ;;  %s1366_s18 = smov [#allocation2]   ;;  %s1505_s0 = inlined_call_operand.vmem [shape: bf16[64,128], index: 0, kind: input, shape index: {}]   ;;  %s1506_s1 = inlined_call_operand.hbm [shape: bf16[128,512], index: 1, kind: input, shape index: {}]   ;;  %s1507_s2 = inlined_call_operand.vmem [shape: f32[1,512], index: 2, kind: input, shape index: {}]   ;;  %s1508_s3 = inlined_call_operand.vmem [shape: bf16[256,128], index: 3, kind: input, shape index: {}]   ;;  %s1509_s4 = inlined_call_operand.vmem [shape: f32[1,128], index: 4, kind: input, shape index: {}]   ;;  %s1510_s5 = inlined_call_operand.vmem [shape: bf16[64,128], index: 5, kind: output, shape index: {}]  }
   0x1   :  { %s18_s19 = sshll.u32 %s1366_s18, 4  ;;  %s19_s19 = int_to_ptr.vmem [resolvable:$true] %s18_s19 }
   0x2   :  { %s1352_s20 = scalar_lea.vmem %s19_s19, 4096  ;;  %p1357_p1 = scmp.lt.s32.totalorder %s19_s19, %s19_s19 }
   0x3   :  { %p1353_p0 = scmp.ne.s32.totalorder %s19_s19, %s1352_s20  ;;  %p1358_p2 = scmp.lt.s32.totalorder %s1352_s20, %s1352_s20 }
   0x5   :  { %p1359_p3 = por %p1358_p2, %p1357_p1 }
   0x7   :  { %p1360_p4 = pnand %p1359_p3, %p1353_p0 }
   0x9   :  { %1363 = shalt.err (!%p1360_p4)
}
   0xa   :  { %s1367_s21 = smov 256   ;;  %s1368_s22 = smov 16  }
   0xb   :  { %24 = dma.hbm_to_vmem [thread:$0]  %s1506_s1, 4096, %s19_s19, [#allocation3], %s1367_s21, %s1367_s21, %s1368_s22  }
   0xc   :  { %1364 = dma.done.wait [#allocation3], 4096  }
   0xd   :  { %1365 = vsyncadd [#allocation3], 4294963200  ;;  %v1292_v0 = vld [vmem:[#allocation2 + $0xe0] ss:$16 sps:$4 sm:$0xff]   ;;  %v1304_v6 = vld [vmem:[#allocation2 + $0xe4] ss:$16 sps:$4 sm:$0xff]  }
   0xe   :  { %v1293_v1 = vld [vmem:[#allocation2 + $0xc0] ss:$16 sps:$4 sm:$0xff]   ;;  %1145 = vmatprep.subr.bf16.mxu0 %v1292_v0  ;;  %v1305_v7 = vld [vmem:[#allocation2 + $0xc4] ss:$16 sps:$4 sm:$0xff]   ;;  %1169 = vmatprep.subr.bf16.mxu1 %v1304_v6  ;;  %v1411_v14 = vld [vmem:[%s1505_s0 + $0x8] sm:$0xff]  }
   0xf   :  { %1146 = vmatpush3.bf16.msra.mxu0 %v1292_v0  ;;  %v1294_v2 = vld [vmem:[#allocation2 + $0xa0] ss:$16 sps:$4 sm:$0xff]   ;;  %1170 = vmatpush3.bf16.msra.mxu1 %v1304_v6  ;;  %v1306_v9 = vld [vmem:[#allocation2 + $0xa4] ss:$16 sps:$4 sm:$0xff]   ;;  %v1423_v16 = vld [vmem:[%s1505_s0 + $0x18] sm:$0xff]  }
  0x10   :  { %1147 = vmatprep.subr.bf16.mxu0 %v1293_v1  ;;  %v1295_v3 = vld [vmem:[#allocation2 + $0x80] ss:$16 sps:$4 sm:$0xff]   ;;  %1171 = vmatprep.subr.bf16.mxu1 %v1305_v7  ;;  %v1307_v11 = vld [vmem:[#allocation2 + $0x84] ss:$16 sps:$4 sm:$0xff]   ;;  %v1312_v20 = vld [vmem:[#allocation2 + $0xe8] ss:$16 sps:$4 sm:$0xff]  }
  0x11   :  { %v1405_v4 = vld [vmem:[%s1505_s0] sm:$0xff]   ;;  %v1416_v15 = vld [vmem:[%s1505_s0 + $0x10] sm:$0xff]   ;;  %v1313_v21 = vld [vmem:[#allocation2 + $0xc8] ss:$16 sps:$4 sm:$0xff]  }
  0x12   :  { %1161 = vmatprep.mubr.bf16.mxu0 %v1405_v4  ;;  %v1296_v5 = vld [vmem:[#allocation2 + $0x60] ss:$16 sps:$4 sm:$0xff]   ;;  %v1308_v13 = vld [vmem:[#allocation2 + $0x64] ss:$16 sps:$4 sm:$0xff]   ;;  %v1314_v22 = vld [vmem:[#allocation2 + $0xa8] ss:$16 sps:$4 sm:$0xff]  }
  0x13   :  { %1148 = vmatpush3.bf16.msra.mxu0 %v1293_v1  ;;  %v1297_v8 = vld [vmem:[#allocation2 + $0x40] ss:$16 sps:$4 sm:$0xff]   ;;  %1172 = vmatpush3.bf16.msra.mxu1 %v1305_v7  ;;  %v1309_v17 = vld [vmem:[#allocation2 + $0x44] ss:$16 sps:$4 sm:$0xff]   ;;  %v1315_v23 = vld [vmem:[#allocation2 + $0x88] ss:$16 sps:$4 sm:$0xff]  }
  0x14   :  { %1149 = vmatprep.subr.bf16.mxu0 %v1294_v2  ;;  %v1298_v10 = vld [vmem:[#allocation2 + $0x20] ss:$16 sps:$4 sm:$0xff]   ;;  %1173 = vmatprep.subr.bf16.mxu1 %v1306_v9  ;;  %v1310_v18 = vld [vmem:[#allocation2 + $0x24] ss:$16 sps:$4 sm:$0xff]   ;;  %v1316_v24 = vld [vmem:[#allocation2 + $0x68] ss:$16 sps:$4 sm:$0xff]  }
  0x15   :  { %v1299_v12 = vld [vmem:[#allocation2] ss:$16 sps:$4 sm:$0xff]   ;;  %v1311_v19 = vld [vmem:[#allocation2 + $0x4] ss:$16 sps:$4 sm:$0xff]   ;;  %v1317_v54 = vld [vmem:[#allocation2 + $0x48] ss:$16 sps:$4 sm:$0xff]  }
  0x16   :  { %v977_v27 = vld [vmem:[%s1507_s2] ss:$0 sm:$0xff]  ;;  %v1318_v55 = vld [vmem:[#allocation2 + $0x28] ss:$16 sps:$4 sm:$0xff]   ;;  %v1320_v57 = vld [vmem:[#allocation2 + $0xec] ss:$16 sps:$4 sm:$0xff]  }
  0x17   :  { %1150 = vmatpush3.bf16.msra.mxu0 %v1294_v2  ;;  %1174 = vmatpush3.bf16.msra.mxu1 %v1306_v9  ;;  %v1319_v56 = vld [vmem:[#allocation2 + $0x8] ss:$16 sps:$4 sm:$0xff]   ;;  %v1321_v58 = vld [vmem:[#allocation2 + $0xcc] ss:$16 sps:$4 sm:$0xff]   ;;  %v990_v0 = vld [vmem:[%s1507_s2 + $0x1] ss:$0 sm:$0xff] }
  0x18   :  { %1151 = vmatprep.subr.bf16.mxu0 %v1295_v3  ;;  %1175 = vmatprep.subr.bf16.mxu1 %v1307_v11  ;;  %v1322_v59 = vld [vmem:[#allocation2 + $0xac] ss:$16 sps:$4 sm:$0xff]  }
  0x19   :  { %v1323_v60 = vld [vmem:[#allocation2 + $0x8c] ss:$16 sps:$4 sm:$0xff]  }
  0x1a   :  { %v1324_v61 = vld [vmem:[#allocation2 + $0x6c] ss:$16 sps:$4 sm:$0xff]  }
  0x1b   :  { %1152 = vmatpush3.bf16.msra.mxu0 %v1295_v3  ;;  %1176 = vmatpush3.bf16.msra.mxu1 %v1307_v11 }
  0x1c   :  { %1153 = vmatprep.subr.bf16.mxu0 %v1296_v5  ;;  %1177 = vmatprep.subr.bf16.mxu1 %v1308_v13 }
  0x1f   :  { %1154 = vmatpush3.bf16.msra.mxu0 %v1296_v5  ;;  %1178 = vmatpush3.bf16.msra.mxu1 %v1308_v13 }
  0x20   :  { %1155 = vmatprep.subr.bf16.mxu0 %v1297_v8  ;;  %1179 = vmatprep.subr.bf16.mxu1 %v1309_v17 }
  0x23   :  { %1156 = vmatpush3.bf16.msra.mxu0 %v1297_v8  ;;  %1180 = vmatpush3.bf16.msra.mxu1 %v1309_v17 }
  0x24   :  { %1157 = vmatprep.subr.bf16.mxu0 %v1298_v10  ;;  %1181 = vmatprep.subr.bf16.mxu1 %v1310_v18 }
  0x27   :  { %1158 = vmatpush3.bf16.msra.mxu0 %v1298_v10  ;;  %1182 = vmatpush3.bf16.msra.mxu1 %v1310_v18 }
  0x28   :  { %1159 = vmatprep.subr.bf16.mxu0 %v1299_v12  ;;  %1183 = vmatprep.subr.bf16.mxu1 %v1311_v19 }
  0x2b   :  { %1160 = vmatpush3.bf16.msra.mxu0 %v1299_v12  ;;  %1184 = vmatpush3.bf16.msra.mxu1 %v1311_v19 }
  0x2c   :  { %1193 = vmatprep.subr.bf16.mxu0 %v1312_v20  ;;  %1217 = vmatprep.subr.bf16.mxu1 %v1320_v57 }
  0x2e   :  { %1162 = vmatmul.mubr.bf16.vlgmr.msra.gmra.mxu0 %v1411_v14 }
  0x2f   :  { %1165 = vmatprep.mubr.bf16.mxu0 %v1416_v15  ;;  %1194 = vmatpush3.bf16.msra.mxu0 %v1312_v20 }
  0x30   :  { %1195 = vmatprep.subr.bf16.mxu0 %v1313_v21 }
  0x33   :  { %1196 = vmatpush3.bf16.msra.mxu0 %v1313_v21 }
  0x34   :  { %1197 = vmatprep.subr.bf16.mxu0 %v1314_v22 }
  0x36   :  { %1166 = vmatmul.mubr.bf16.gmra.mxu0 %v1423_v16 }
  0x37   :  { %1198 = vmatpush3.bf16.msra.mxu0 %v1314_v22 }
  0x38   :  { %1199 = vmatprep.subr.bf16.mxu0 %v1315_v23 }
  0x3b   :  { %1200 = vmatpush3.bf16.msra.mxu0 %v1315_v23 }
  0x3c   :  { %1201 = vmatprep.subr.bf16.mxu0 %v1316_v24 }
  0x3f   :  { %1202 = vmatpush3.bf16.msra.mxu0 %v1316_v24 }
  0x40   :  { %1203 = vmatprep.subr.bf16.mxu0 %v1317_v54 }
  0x43   :  { %1204 = vmatpush3.bf16.msra.mxu0 %v1317_v54 }
  0x44   :  { %1205 = vmatprep.subr.bf16.mxu0 %v1318_v55 }
  0x47   :  { %1206 = vmatpush3.bf16.msra.mxu0 %v1318_v55 }
  0x48   :  { %1207 = vmatprep.subr.bf16.mxu0 %v1319_v56 }
  0x4b   :  { %1208 = vmatpush3.bf16.msra.mxu0 %v1319_v56 }
  0xee   :  { %v1163_v25 = vpop.f32.mrf.mxu0 }
  0xef   :  { %v181_v31 = vadd.f32 %v1163_v25, %v977_v27 }
  0xf0   :  { %v172_v26 = vpop.f32.mrf.mxu0 }
  0xf1   :  { %v173_v29 = vadd.f32 %v977_v27, %v172_v26  ;;  %v205_v38 = vmax.f32 %v181_v31, 0.0  ;;  %v1325_v31 = vld [vmem:[#allocation2 + $0x4c] ss:$16 sps:$4 sm:$0xff]  }
  0xf2   :  { %v1164_v28 = vpop.f32.mrf.mxu0 }
  0xf3   :  { %v184_v30 = vadd.f32 %v1164_v28, %v977_v27  ;;  %v203_v36 = vmax.f32 %v173_v29, 0.0 }
  0xf4   :  { %v175_v32 = vpop.f32.mrf.mxu0 }
  0xf5   :  { %v176_v33 = vadd.f32 %v977_v27, %v175_v32  ;;  %v206_v34 = vmax.f32 %v184_v30, 0.0  ;;  %v1326_v32 = vld [vmem:[#allocation2 + $0x2c] ss:$16 sps:$4 sm:$0xff]  }
  0xf6   :  { %v1167_v35 = vpop.f32.mrf.mxu0 }
  0xf7   :  { %v204_v37 = vmax.f32 %v176_v33, 0.0  ;;  %v212_v41 = vpack.c.bf16 %v206_v34, %v205_v38  ;;  %v197_v45 = vadd.f32 %v1167_v35, %v977_v27  ;;  %v1327_v33 = vld [vmem:[#allocation2 + $0xc] ss:$16 sps:$4 sm:$0xff]   ;;  %v1329_v35 = vld [vmem:[%s1508_s3 + $0x70] sm:$0xff]  }
  0xf8   :  { %v188_v39 = vpop.f32.mrf.mxu0  ;;  %v1328_v34 = vld [vmem:[%s1508_s3 + $0x78] sm:$0xff]  }
  0xf9   :  { %v211_v40 = vpack.c.bf16 %v204_v37, %v203_v36  ;;  %v189_v43 = vadd.f32 %v977_v27, %v188_v39  ;;  %v209_v51 = vmax.f32 %v197_v45, 0.0  ;;  %1241 = vmatprep.subr.bf16.mxu0 %v1328_v34  ;;  %v1331_v36 = vld [vmem:[%s1508_s3 + $0x68] sm:$0xff]   ;;  %v1333_v37 = vld [vmem:[%s1508_s3 + $0x60] sm:$0xff]   ;;  %v1335_v38 = vld [vmem:[%s1508_s3 + $0x58] sm:$0xff]  }
  0xfa   :  { %v1168_v42 = vpop.f32.mrf.mxu0  ;;  %v1337_v39 = vld [vmem:[%s1508_s3 + $0x50] sm:$0xff]  }
  0xfb   :  { %v200_v44 = vadd.f32 %v1168_v42, %v977_v27  ;;  %1185 = vmatprep.mubr.bf16.mxu1 %v211_v40  ;;  %v207_v49 = vmax.f32 %v189_v43, 0.0  ;;  %v999_v42 = vld [vmem:[%s1507_s2 + $0x2] ss:$0 sm:$0xff] }
  0xfc   :  { %v191_v46 = vpop.f32.mrf.mxu0  ;;  %1186 = vmatmul.mubr.bf16.vlgmr.msra.gmra.mxu1 %v212_v41 }
  0xfd   :  { %v192_v47 = vadd.f32 %v977_v27, %v191_v46  ;;  %v210_v48 = vmax.f32 %v200_v44, 0.0  ;;  %1218 = vmatpush3.bf16.msra.mxu1 %v1320_v57 }
  0xfe   :  { %1219 = vmatprep.subr.bf16.mxu1 %v1321_v58 }
  0xff   :  { %v208_v50 = vmax.f32 %v192_v47, 0.0  ;;  %v214_v53 = vpack.c.bf16 %v210_v48, %v209_v51 }
 0x101   :  { %v213_v52 = vpack.c.bf16 %v208_v50, %v207_v49  ;;  %1220 = vmatpush3.bf16.msra.mxu1 %v1321_v58  ;;  %v1332_v58 = vld [vmem:[%s1508_s3 + $0x30] sm:$0xff]  }
 0x102   :  { %1221 = vmatprep.subr.bf16.mxu1 %v1322_v59 }
 0x103   :  { %1189 = vmatprep.mubr.bf16.mxu1 %v213_v52 }
 0x104   :  { %1190 = vmatmul.mubr.bf16.gmra.mxu1 %v214_v53 }
 0x105   :  { %1222 = vmatpush3.bf16.msra.mxu1 %v1322_v59 }
 0x106   :  { %1223 = vmatprep.subr.bf16.mxu1 %v1323_v60 }
 0x109   :  { %1224 = vmatpush3.bf16.msra.mxu1 %v1323_v60 }
 0x10a   :  { %1225 = vmatprep.subr.bf16.mxu1 %v1324_v61 }
 0x10d   :  { %1226 = vmatpush3.bf16.msra.mxu1 %v1324_v61 }
 0x10e   :  { %1227 = vmatprep.subr.bf16.mxu1 %v1325_v31 }
 0x111   :  { %1228 = vmatpush3.bf16.msra.mxu1 %v1325_v31 }
 0x112   :  { %1229 = vmatprep.subr.bf16.mxu1 %v1326_v32 }
 0x115   :  { %1230 = vmatpush3.bf16.msra.mxu1 %v1326_v32 }
 0x116   :  { %1231 = vmatprep.subr.bf16.mxu1 %v1327_v33 }
 0x119   :  { %1232 = vmatpush3.bf16.msra.mxu1 %v1327_v33 }
 0x1bc   :  { %v1187_v62 = vpop.f32.mrf.mxu1 }
 0x1bd   :  { %v329_v5 = vadd.f32 %v1187_v62, %v990_v0 }
 0x1be   :  { %v320_v63 = vpop.f32.mrf.mxu1 }
 0x1bf   :  { %v321_v2 = vadd.f32 %v990_v0, %v320_v63  ;;  %v353_v12 = vmax.f32 %v329_v5, 0.0 }
 0x1c0   :  { %v1188_v1 = vpop.f32.mrf.mxu1 }
 0x1c1   :  { %v332_v3 = vadd.f32 %v1188_v1, %v990_v0  ;;  %v351_v10 = vmax.f32 %v321_v2, 0.0  ;;  %v1334_v1 = vld [vmem:[%s1508_s3 + $0x28] sm:$0xff]  }
 0x1c2   :  { %v323_v6 = vpop.f32.mrf.mxu1 }
 0x1c3   :  { %v324_v7 = vadd.f32 %v990_v0, %v323_v6  ;;  %v354_v8 = vmax.f32 %v332_v3, 0.0 }
 0x1c4   :  { %v1191_v9 = vpop.f32.mrf.mxu1 }
 0x1c5   :  { %v352_v11 = vmax.f32 %v324_v7, 0.0  ;;  %v360_v18 = vpack.c.bf16 %v354_v8, %v353_v12  ;;  %v345_v22 = vadd.f32 %v1191_v9, %v990_v0  ;;  %v1336_v8 = vld [vmem:[%s1508_s3 + $0x20] sm:$0xff]   ;;  %v1338_v9 = vld [vmem:[%s1508_s3 + $0x18] sm:$0xff]  }
 0x1c6   :  { %v336_v13 = vpop.f32.mrf.mxu1  ;;  %v1341_v12 = vld [vmem:[%s1508_s3 + $0x40] sm:$0xff]  }
 0x1c7   :  { %v359_v17 = vpack.c.bf16 %v352_v11, %v351_v10  ;;  %v337_v20 = vadd.f32 %v990_v0, %v336_v13  ;;  %v357_v28 = vmax.f32 %v345_v22, 0.0  ;;  %v1339_v10 = vld [vmem:[%s1508_s3 + $0x48] sm:$0xff]   ;;  %v1340_v11 = vld [vmem:[%s1508_s3 + $0x10] sm:$0xff]  }
 0x1c8   :  { %v1192_v19 = vpop.f32.mrf.mxu1  ;;  %v1342_v13 = vld [vmem:[%s1508_s3 + $0x8] sm:$0xff]  }
 0x1c9   :  { %v348_v21 = vadd.f32 %v1192_v19, %v990_v0  ;;  %1209 = vmatprep.mubr.bf16.mxu0 %v359_v17  ;;  %v355_v26 = vmax.f32 %v337_v20, 0.0  ;;  %v1343_v17 = vld [vmem:[%s1508_s3] sm:$0xff]  }
 0x1ca   :  { %v339_v23 = vpop.f32.mrf.mxu1  ;;  %1210 = vmatmul.mubr.bf16.vlgmr.msra.gmra.mxu0 %v360_v18  ;;  %v1008_v20 = vld [vmem:[%s1507_s2 + $0x3] ss:$0 sm:$0xff] }
 0x1cb   :  { %v340_v24 = vadd.f32 %v990_v0, %v339_v23  ;;  %v358_v25 = vmax.f32 %v348_v21, 0.0  ;;  %1242 = vmatpush3.bf16.msra.mxu0 %v1328_v34 }
 0x1cc   :  { %1243 = vmatprep.subr.bf16.mxu0 %v1329_v35 }
 0x1cd   :  { %v356_v27 = vmax.f32 %v340_v24, 0.0  ;;  %v362_v30 = vpack.c.bf16 %v358_v25, %v357_v28 }
 0x1cf   :  { %v361_v29 = vpack.c.bf16 %v356_v27, %v355_v26  ;;  %1244 = vmatpush3.bf16.msra.mxu0 %v1329_v35 }
 0x1d0   :  { %1245 = vmatprep.subr.bf16.mxu0 %v1331_v36 }
 0x1d1   :  { %1213 = vmatprep.mubr.bf16.mxu0 %v361_v29 }
 0x1d2   :  { %1214 = vmatmul.mubr.bf16.gmra.mxu0 %v362_v30 }
 0x1d3   :  { %1257 = vmatprep.mubr.bf16.mxu0 %v1405_v4  ;;  %v1330_v4 = vld [vmem:[%s1508_s3 + $0x38] sm:$0xff]   ;;  %1246 = vmatpush3.bf16.msra.mxu0 %v1331_v36 }
 0x1d4   :  { %1265 = vmatprep.subr.bf16.mxu1 %v1330_v4  ;;  %1247 = vmatprep.subr.bf16.mxu0 %v1333_v37 }
 0x1d7   :  { %1248 = vmatpush3.bf16.msra.mxu0 %v1333_v37 }
 0x1d8   :  { %1249 = vmatprep.subr.bf16.mxu0 %v1335_v38 }
 0x1db   :  { %1250 = vmatpush3.bf16.msra.mxu0 %v1335_v38 }
 0x1dc   :  { %1251 = vmatprep.subr.bf16.mxu0 %v1337_v39 }
 0x1df   :  { %1252 = vmatpush3.bf16.msra.mxu0 %v1337_v39 }
 0x1e0   :  { %1253 = vmatprep.subr.bf16.mxu0 %v1339_v10 }
 0x1e3   :  { %1254 = vmatpush3.bf16.msra.mxu0 %v1339_v10 }
 0x1e4   :  { %1255 = vmatprep.subr.bf16.mxu0 %v1341_v12 }
 0x1e7   :  { %1256 = vmatpush3.bf16.msra.mxu0 %v1341_v12 }
 0x1ea   :  { %1258 = vmatmul.mubr.bf16.vlgmr.msra.gmra.mxu0 %v1411_v14 }
 0x1eb   :  { %1261 = vmatprep.mubr.bf16.mxu0 %v1416_v15 }
 0x1f2   :  { %1262 = vmatmul.mubr.bf16.gmra.mxu0 %v1423_v16 }
 0x28a   :  { %v1211_v40 = vpop.f32.mrf.mxu0 }
 0x28b   :  { %v477_v46 = vadd.f32 %v1211_v40, %v999_v42 }
 0x28c   :  { %v468_v41 = vpop.f32.mrf.mxu0 }
 0x28d   :  { %v469_v44 = vadd.f32 %v999_v42, %v468_v41  ;;  %v501_v53 = vmax.f32 %v477_v46, 0.0 }
 0x28e   :  { %v1212_v43 = vpop.f32.mrf.mxu0 }
 0x28f   :  { %v480_v45 = vadd.f32 %v1212_v43, %v999_v42  ;;  %v499_v51 = vmax.f32 %v469_v44, 0.0 }
 0x290   :  { %v471_v47 = vpop.f32.mrf.mxu0 }
 0x291   :  { %v472_v48 = vadd.f32 %v999_v42, %v471_v47  ;;  %v502_v49 = vmax.f32 %v480_v45, 0.0 }
 0x292   :  { %v1215_v50 = vpop.f32.mrf.mxu0 }
 0x293   :  { %v500_v52 = vmax.f32 %v472_v48, 0.0  ;;  %v508_v56 = vpack.c.bf16 %v502_v49, %v501_v53  ;;  %v493_v61 = vadd.f32 %v1215_v50, %v999_v42 }
 0x294   :  { %v484_v54 = vpop.f32.mrf.mxu0 }
 0x295   :  { %v507_v55 = vpack.c.bf16 %v500_v52, %v499_v51  ;;  %v485_v59 = vadd.f32 %v999_v42, %v484_v54  ;;  %v505_v5 = vmax.f32 %v493_v61, 0.0  ;;  %v1033_v51 = vld [vmem:[%s1509_s4] ss:$0 sm:$0xff] }
 0x296   :  { %v1216_v57 = vpop.f32.mrf.mxu0 }
 0x297   :  { %v496_v60 = vadd.f32 %v1216_v57, %v999_v42  ;;  %1233 = vmatprep.mubr.bf16.mxu1 %v507_v55  ;;  %v503_v2 = vmax.f32 %v485_v59, 0.0 }
 0x298   :  { %v487_v62 = vpop.f32.mrf.mxu0  ;;  %1234 = vmatmul.mubr.bf16.vlgmr.msra.gmra.mxu1 %v508_v56 }
 0x299   :  { %v488_v63 = vadd.f32 %v999_v42, %v487_v62  ;;  %1266 = vmatpush3.bf16.msra.mxu1 %v1330_v4  ;;  %v506_v0 = vmax.f32 %v496_v60, 0.0 }
 0x29a   :  { %1267 = vmatprep.subr.bf16.mxu1 %v1332_v58 }
 0x29b   :  { %v504_v3 = vmax.f32 %v488_v63, 0.0  ;;  %v510_v7 = vpack.c.bf16 %v506_v0, %v505_v5 }
 0x29d   :  { %v509_v6 = vpack.c.bf16 %v504_v3, %v503_v2  ;;  %1268 = vmatpush3.bf16.msra.mxu1 %v1332_v58 }
 0x29e   :  { %1269 = vmatprep.subr.bf16.mxu1 %v1334_v1 }
 0x29f   :  { %1237 = vmatprep.mubr.bf16.mxu1 %v509_v6 }
 0x2a0   :  { %1238 = vmatmul.mubr.bf16.gmra.mxu1 %v510_v7 }
 0x2a1   :  { %1270 = vmatpush3.bf16.msra.mxu1 %v1334_v1 }
 0x2a2   :  { %1271 = vmatprep.subr.bf16.mxu1 %v1336_v8 }
 0x2a5   :  { %1272 = vmatpush3.bf16.msra.mxu1 %v1336_v8 }
 0x2a6   :  { %1273 = vmatprep.subr.bf16.mxu1 %v1338_v9 }
 0x2a9   :  { %1274 = vmatpush3.bf16.msra.mxu1 %v1338_v9 }
 0x2aa   :  { %1275 = vmatprep.subr.bf16.mxu1 %v1340_v11  ;;  %v1259_v43 = vpop.f32.mrf.mxu0 }
 0x2ac   :  { %v773_v44 = vpop.f32.mrf.mxu0 }
 0x2ad   :  { %1276 = vmatpush3.bf16.msra.mxu1 %v1340_v11 }
 0x2ae   :  { %1277 = vmatprep.subr.bf16.mxu1 %v1342_v13  ;;  %v1260_v45 = vpop.f32.mrf.mxu0 }
 0x2b0   :  { %v776_v46 = vpop.f32.mrf.mxu0 }
 0x2b1   :  { %1278 = vmatpush3.bf16.msra.mxu1 %v1342_v13 }
 0x2b2   :  { %1279 = vmatprep.subr.bf16.mxu1 %v1343_v17  ;;  %v1263_v48 = vpop.f32.mrf.mxu0 }
 0x2b4   :  { %v789_v55 = vpop.f32.mrf.mxu0 }
 0x2b5   :  { %1280 = vmatpush3.bf16.msra.mxu1 %v1343_v17 }
 0x2b6   :  { %v1264_v0 = vpop.f32.mrf.mxu0 }
 0x2b8   :  { %v792_v8 = vpop.f32.mrf.mxu0 }
 0x358   :  { %v1235_v18 = vpop.f32.mrf.mxu1 }
 0x359   :  { %v625_v14 = vadd.f32 %v1235_v18, %v1008_v20 }
 0x35a   :  { %v616_v19 = vpop.f32.mrf.mxu1 }
 0x35b   :  { %v617_v22 = vadd.f32 %v1008_v20, %v616_v19  ;;  %v649_v29 = vmax.f32 %v625_v14, 0.0 }
 0x35c   :  { %v1236_v21 = vpop.f32.mrf.mxu1 }
 0x35d   :  { %v628_v23 = vadd.f32 %v1236_v21, %v1008_v20  ;;  %v647_v28 = vmax.f32 %v617_v22, 0.0 }
 0x35e   :  { %v619_v24 = vpop.f32.mrf.mxu1 }
 0x35f   :  { %v620_v25 = vadd.f32 %v1008_v20, %v619_v24  ;;  %v650_v26 = vmax.f32 %v628_v23, 0.0 }
 0x360   :  { %v1239_v27 = vpop.f32.mrf.mxu1 }
 0x361   :  { %v648_v15 = vmax.f32 %v620_v25, 0.0  ;;  %v656_v16 = vpack.c.bf16 %v650_v26, %v649_v29  ;;  %v641_v35 = vadd.f32 %v1239_v27, %v1008_v20 }
 0x362   :  { %v632_v30 = vpop.f32.mrf.mxu1 }
 0x363   :  { %v655_v31 = vpack.c.bf16 %v648_v15, %v647_v28  ;;  %v633_v33 = vadd.f32 %v1008_v20, %v632_v30  ;;  %v653_v40 = vmax.f32 %v641_v35, 0.0 }
 0x364   :  { %v1240_v32 = vpop.f32.mrf.mxu1 }
 0x365   :  { %v644_v34 = vadd.f32 %v1240_v32, %v1008_v20  ;;  %1281 = vmatprep.mubr.bf16.mxu1 %v655_v31  ;;  %v651_v38 = vmax.f32 %v633_v33, 0.0 }
 0x366   :  { %v635_v4 = vpop.f32.mrf.mxu1  ;;  %1282 = vmatmul.mubr.bf16.vlgmr.msra.gmra.mxu1 %v656_v16 }
 0x367   :  { %v636_v36 = vadd.f32 %v1008_v20, %v635_v4  ;;  %v654_v37 = vmax.f32 %v644_v34, 0.0 }
 0x369   :  { %v652_v39 = vmax.f32 %v636_v36, 0.0  ;;  %v658_v42 = vpack.c.bf16 %v654_v37, %v653_v40 }
 0x36b   :  { %v657_v41 = vpack.c.bf16 %v652_v39, %v651_v38 }
 0x36d   :  { %1285 = vmatprep.mubr.bf16.mxu1 %v657_v41 }
 0x36e   :  { %1286 = vmatmul.mubr.bf16.gmra.mxu1 %v658_v42 }
 0x426   :  { %v1283_v47 = vpop.f32.mrf.mxu1 }
 0x427   :  { %v895_v50 = vadd.f32 %v1283_v47, %v1259_v43 }
 0x428   :  { %v886_v49 = vpop.f32.mrf.mxu1 }
 0x429   :  { %v887_v53 = vadd.f32 %v886_v49, %v773_v44  ;;  %v926_v57 = vadd.f32 %v1033_v51, %v895_v50 }
 0x42a   :  { %v1284_v52 = vpop.f32.mrf.mxu1 }
 0x42b   :  { %v898_v54 = vadd.f32 %v1284_v52, %v1260_v45  ;;  %v924_v61 = vadd.f32 %v1033_v51, %v887_v53 }
 0x42c   :  { %v889_v56 = vpop.f32.mrf.mxu1 }
 0x42d   :  { %v927_v58 = vadd.f32 %v1033_v51, %v898_v54  ;;  %v890_v59 = vadd.f32 %v889_v56, %v776_v46 }
 0x42e   :  { %v1287_v60 = vpop.f32.mrf.mxu1 }
 0x42f   :  { %v1058_v62 = vpack.c.bf16 %v927_v58, %v926_v57  ;;  %v925_v63 = vadd.f32 %v1033_v51, %v890_v59  ;;  %v911_v3 = vadd.f32 %v1287_v60, %v1263_v48 }
 0x430   :  { %v902_v1 = vpop.f32.mrf.mxu1 }
 0x431   :  { %1070 = vst [vmem:[%s1510_s5 + $0x8] sm:$0xff] %v1058_v62   ;;  %v1053_v2 = vpack.c.bf16 %v925_v63, %v924_v61  ;;  %v903_v6 = vadd.f32 %v902_v1, %v789_v55  ;;  %v930_v10 = vadd.f32 %v1033_v51, %v911_v3 }
 0x432   :  { %v1288_v5 = vpop.f32.mrf.mxu1 }
 0x433   :  { %1054 = vst [vmem:[%s1510_s5] sm:$0xff] %v1053_v2   ;;  %v914_v7 = vadd.f32 %v1288_v5, %v1264_v0  ;;  %v928_v13 = vadd.f32 %v1033_v51, %v903_v6 }
 0x434   :  { %v905_v9 = vpop.f32.mrf.mxu1 }
 0x435   :  { %v931_v11 = vadd.f32 %v1033_v51, %v914_v7  ;;  %v906_v12 = vadd.f32 %v905_v9, %v792_v8 }
 0x437   :  { %v1068_v17 = vpack.c.bf16 %v931_v11, %v930_v10  ;;  %v929_v18 = vadd.f32 %v1033_v51, %v906_v12 }
 0x439   :  { %1072 = vst [vmem:[%s1510_s5 + $0x18] sm:$0xff] %v1068_v17   ;;  %v1063_v19 = vpack.c.bf16 %v929_v18, %v928_v13 }
 0x43b   :  { %1071 = vst [vmem:[%s1510_s5 + $0x10] sm:$0xff] %v1063_v19  }
 0x43c   :  { %976 = vsyncpa [#allocation3], 1 }

</bundles_post_ra>
